<compile_context>
chip_gen: v6e
topology: v6e:2x2x1
jax: 0.10.0
libtpu: 0.0.40
codegen_flags: <defaults>
</compile_context>

<pallas_src>
import math

import jax
import jax.numpy as jnp
from jax.experimental import pallas as pl
from jax.experimental.pallas import tpu as pltpu

_SQRT_HALF = 1.0 / math.sqrt(2.0)


def _gelu_exact(x):
    # nn.GELU default: 0.5 * x * (1 + erf(x / sqrt(2)))
    return 0.5 * x * (1.0 + jax.lax.erf(x * _SQRT_HALF))


def _round_up(x, m):
    return (x + m - 1) // m * m


def _vmem_capacity_bytes():
    try:
        return int(pltpu.get_tpu_info().vmem_capacity_bytes)
    except Exception:
        return 64 * 1024 * 1024  # conservative default (v7x per-TC VMEM)


def mlp_kernel(x_ref, w1_ref, b1_ref, w2_ref, b2_ref, o_ref):
    # x: (TM, IN_P) bf16, w1: (IN_P, H_P) bf16, b1: (1, H_P) f32,
    # w2: (H_P, OUT_P) bf16, b2: (1, OUT_P) f32, o: (TM, OUT_P) f32.
    h = jnp.dot(x_ref[...], w1_ref[...], preferred_element_type=jnp.float32)
    h = _gelu_exact(h + b1_ref[...])                      # BN already folded into w1/b1
    y = jnp.dot(h.astype(w2_ref.dtype), w2_ref[...],
                preferred_element_type=jnp.float32)
    y = _gelu_exact(y + b2_ref[...])                      # BN already folded into w2/b2
    o_ref[...] = y.astype(o_ref.dtype)


def _choose_tile_and_limit(B16, in_p, h_p, out_p, vmem_cap):
    # 48 MiB limit on 64 MiB chips (v7x), ~96 MiB on 128 MiB chips (v5e/v6e).
    vmem_limit = min(int(vmem_cap * 0.75), 100 * 1024 * 1024)

    # Weights/biases are single-buffered and VMEM-resident for the whole grid.
    fixed = (in_p * h_p + h_p * out_p) * 2 + (h_p + out_p) * 4
    # Per-batch-row bytes: double-buffered bf16 x tile, double-buffered f32 out tile,
    # f32 hidden intermediate + its bf16 cast.
    per_row = 2 * in_p * 2 + 2 * out_p * 4 + h_p * (4 + 2)
    budget = int(vmem_limit * 0.8) - fixed

    tm_cap = 1024 if vmem_cap > 64 * 1024 * 1024 else 512
    tm = min(tm_cap, budget // per_row) if budget > per_row * 16 else 16
    tm = max(16, (tm // 16) * 16)          # bf16 packs 2 rows/sublane -> 16-row granule
    if tm >= 256:
        tm = (tm // 256) * 256             # 256-aligned M fills v6e's 256x256 MXU passes
    tm = min(tm, B16)

    # Guarantee >= 2 batch tiles when the batch allows, so both v7x TCs get work.
    if B16 > 16 and _round_up(B16, tm) // tm < 2:
        tm = max(16, _round_up((B16 + 1) // 2, 16))
    return tm, vmem_limit


def make_mlp(w1f, b1f, w2f, b2f):
    """Build a jitted forward. BN is already folded into (w*f, b*f). All weight
    padding and the f32->bf16 cast happen ONCE here, not per forward call."""
    in_f, hid = w1f.shape
    out_f = w2f.shape[1]

    IN_P = _round_up(in_f, 128)
    H_P = _round_up(hid, 128)
    OUT_P = _round_up(out_f, 128)

    # Zero padding is exact: padded hidden cols give h = GELU(0 + 0) = 0, and the
    # matching zero rows of w2 contribute nothing; padded output cols are sliced off.
    w1p = jnp.zeros((IN_P, H_P), jnp.bfloat16).at[:in_f, :hid].set(w1f.astype(jnp.bfloat16))
    b1p = jnp.zeros((1, H_P), jnp.float32).at[0, :hid].set(b1f)
    w2p = jnp.zeros((H_P, OUT_P), jnp.bfloat16).at[:hid, :out_f].set(w2f.astype(jnp.bfloat16))
    b2p = jnp.zeros((1, OUT_P), jnp.float32).at[0, :out_f].set(b2f)

    vmem_cap = _vmem_capacity_bytes()
    # TODO(synk): if the bf16 weights alone exceed the per-chip VMEM budget (e.g. two
    # 4096-wide layers on v7x), add a grid axis over H_P/OUT_P instead of keeping both
    # weights fully VMEM-resident.

    @jax.jit
    def forward(x):
        B = x.shape[0]
        B16 = _round_up(B, 16)
        TM, vmem_limit = _choose_tile_and_limit(B16, IN_P, H_P, OUT_P, vmem_cap)
        B_P = _round_up(B16, TM)
        grid = (B_P // TM,)

        xp = jnp.zeros((B_P, IN_P), jnp.bfloat16).at[:B, :in_f].set(x.astype(jnp.bfloat16))

        resident = pl.Buffered(1)   # grid-invariant operands: no double-buffering
        cost = pl.CostEstimate(
            flops=2 * B_P * (IN_P * H_P + H_P * OUT_P),
            transcendentals=B_P * (H_P + OUT_P),
            bytes_accessed=(B_P * IN_P * 2 + IN_P * H_P * 2 + H_P * OUT_P * 2
                            + (H_P + OUT_P) * 4 + B_P * OUT_P * 4),
        )

        out = pl.pallas_call(
            mlp_kernel,
            out_shape=jax.ShapeDtypeStruct((B_P, OUT_P), jnp.float32),
            grid_spec=pltpu.PrefetchScalarGridSpec(
                num_scalar_prefetch=0,
                grid=grid,
                in_specs=[
                    pl.BlockSpec((TM, IN_P), lambda i: (i, 0)),     # x: tiled over batch
                    pl.BlockSpec((IN_P, H_P), lambda i: (0, 0), pipeline_mode=resident),
                    pl.BlockSpec((1, H_P), lambda i: (0, 0), pipeline_mode=resident),
                    pl.BlockSpec((H_P, OUT_P), lambda i: (0, 0), pipeline_mode=resident),
                    pl.BlockSpec((1, OUT_P), lambda i: (0, 0), pipeline_mode=resident),
                ],
                out_specs=pl.BlockSpec((TM, OUT_P), lambda i: (i, 0)),
            ),
            compiler_params=pltpu.CompilerParams(
                dimension_semantics=("parallel",),   # batch axis shards across TCs (v7x)
                vmem_limit_bytes=vmem_limit,
            ),
            cost_estimate=cost,
        )(xp, w1p, b1p, w2p, b2p)

        return out[:B, :out_f]

    return forward


def fold_linear_bn(w, b, bn, eps=1e-5):
    """Fold BatchNorm1d (running stats) into the preceding Linear: y = x @ W' + b'."""
    scale = bn["gamma"] / jnp.sqrt(bn["var"] + eps)
    shift = bn["beta"] - bn["mean"] * scale
    return w * scale[None, :], b * scale + shift


def make_params(key, in_features, hidden_features, out_features):
    """PyTorch-Linear-style uniform init; BatchNorm1d at its defaults."""
    k1, k2, k3, k4 = jax.random.split(key, 4)

    bound1 = 1.0 / math.sqrt(in_features)
    w1 = jax.random.uniform(k1, (in_features, hidden_features), jnp.float32, -bound1, bound1)
    b1 = jax.random.uniform(k2, (hidden_features,), jnp.float32, -bound1, bound1)

    bound2 = 1.0 / math.sqrt(hidden_features)
    w2 = jax.random.uniform(k3, (hidden_features, out_features), jnp.float32, -bound2, bound2)
    b2 = jax.random.uniform(k4, (out_features,), jnp.float32, -bound2, bound2)

    def bn_defaults(n):
        return dict(gamma=jnp.ones((n,), jnp.float32), beta=jnp.zeros((n,), jnp.float32),
                    mean=jnp.zeros((n,), jnp.float32), var=jnp.ones((n,), jnp.float32))

    return (w1, b1, bn_defaults(hidden_features)), (w2, b2, bn_defaults(out_features))


if __name__ == "__main__":
    in_features, hidden_features, out_features = 32, 64, 16
    batch = 8

    key = jax.random.PRNGKey(0)
    kx, kp = jax.random.split(key)
    x = jax.random.normal(kx, (batch, in_features), jnp.float32)
    (w1, b1, bn1), (w2, b2, bn2) = make_params(kp, in_features, hidden_features, out_features)

    # Fold BN into the Linear layers once, at parameter time.
    w1f, b1f = fold_linear_bn(w1, b1, bn1)
    w2f, b2f = fold_linear_bn(w2, b2, bn2)

    # Pad + cast weights once; returns a jitted forward closed over padded params.
    mlp_forward = make_mlp(w1f, b1f, w2f, b2f)

    out = mlp_forward(x)
    jax.block_until_ready(out)

    # Plain-JAX f32 reference of the same eval-mode semantics.
    h_ref = _gelu_exact(x @ w1f + b1f)
    y_ref = _gelu_exact(h_ref @ w2f + b2f)
    assert out.shape == (batch, out_features)
    # bf16 matmul operands -> relaxed tolerance vs the f32 reference.
    assert jnp.allclose(out, y_ref, atol=3e-2, rtol=3e-2), \
        float(jnp.max(jnp.abs(out - y_ref)))

    print("KERNEL_OK")
</pallas_src>

<mosaic_0001>
module attributes {stable_mosaic.version = 11 : i64} {
  func.func @mlp_kernel(%arg0: i32, %arg1: memref<16x128xbf16, #tpu.memory_space<vmem>>, %arg2: memref<128x128xbf16, #tpu.memory_space<vmem>>, %arg3: memref<1x128xf32, #tpu.memory_space<vmem>>, %arg4: memref<128x128xbf16, #tpu.memory_space<vmem>>, %arg5: memref<1x128xf32, #tpu.memory_space<vmem>>, %arg6: memref<16x128xf32, #tpu.memory_space<vmem>>) attributes {dimension_semantics = [#tpu.dimension_semantics<parallel>], iteration_bounds = array<i64: 1>, scalar_prefetch = 0 : i64, scratch_operands = 0 : i64, tpu.core_type = #tpu.core_type<tc>, window_params = [{transform_indices = @transform_0, window_bounds = array<i64: 16, 128>}, {pipeline_mode = #tpu.pipeline_mode<synchronous>, transform_indices = @transform_1, window_bounds = array<i64: 128, 128>}, {pipeline_mode = #tpu.pipeline_mode<synchronous>, transform_indices = @transform_2, window_bounds = array<i64: 1, 128>}, {pipeline_mode = #tpu.pipeline_mode<synchronous>, transform_indices = @transform_3, window_bounds = array<i64: 128, 128>}, {pipeline_mode = #tpu.pipeline_mode<synchronous>, transform_indices = @transform_4, window_bounds = array<i64: 1, 128>}, {transform_indices = @transform_5, window_bounds = array<i64: 16, 128>}]} {
    %c0 = arith.constant 0 : index
    %c0_0 = arith.constant 0 : index
    %0 = vector.load %arg1[%c0, %c0_0] : memref<16x128xbf16, #tpu.memory_space<vmem>>, vector<16x128xbf16>
    %c0_1 = arith.constant 0 : index
    %c0_2 = arith.constant 0 : index
    %1 = vector.load %arg2[%c0_1, %c0_2] : memref<128x128xbf16, #tpu.memory_space<vmem>>, vector<128x128xbf16>
    %cst = arith.constant dense<0.000000e+00> : vector<16x128xf32>
    %2 = tpu.matmul %0, %1, %cst {dimension_numbers = #tpu.dot_dimension_numbers<[1], [0], [0], [1], [0, 0, 1, 1], [], []>} : vector<16x128xbf16>, vector<128x128xbf16>, vector<16x128xf32> -> vector<16x128xf32>
    %c0_3 = arith.constant 0 : index
    %c0_4 = arith.constant 0 : index
    %3 = vector.load %arg3[%c0_3, %c0_4] : memref<1x128xf32, #tpu.memory_space<vmem>>, vector<1x128xf32>
    %4 = vector.broadcast %3 : vector<1x128xf32> to vector<16x128xf32>
    %5 = arith.addf %2, %4 : vector<16x128xf32>
    %cst_5 = arith.constant 5.000000e-01 : f32
    %6 = vector.broadcast %cst_5 : f32 to vector<16x128xf32>
    %7 = arith.mulf %6, %5 : vector<16x128xf32>
    %cst_6 = arith.constant 0.707106769 : f32
    %8 = vector.broadcast %cst_6 : f32 to vector<16x128xf32>
    %9 = arith.mulf %5, %8 : vector<16x128xf32>
    %10 = math.erf %9 : vector<16x128xf32>
    %cst_7 = arith.constant 1.000000e+00 : f32
    %11 = vector.broadcast %cst_7 : f32 to vector<16x128xf32>
    %12 = arith.addf %11, %10 : vector<16x128xf32>
    %13 = arith.mulf %7, %12 : vector<16x128xf32>
    %14 = arith.truncf %13 : vector<16x128xf32> to vector<16x128xbf16>
    %c0_8 = arith.constant 0 : index
    %c0_9 = arith.constant 0 : index
    %15 = vector.load %arg4[%c0_8, %c0_9] : memref<128x128xbf16, #tpu.memory_space<vmem>>, vector<128x128xbf16>
    %cst_10 = arith.constant dense<0.000000e+00> : vector<16x128xf32>
    %16 = tpu.matmul %14, %15, %cst_10 {dimension_numbers = #tpu.dot_dimension_numbers<[1], [0], [0], [1], [0, 0, 1, 1], [], []>} : vector<16x128xbf16>, vector<128x128xbf16>, vector<16x128xf32> -> vector<16x128xf32>
    %c0_11 = arith.constant 0 : index
    %c0_12 = arith.constant 0 : index
    %17 = vector.load %arg5[%c0_11, %c0_12] : memref<1x128xf32, #tpu.memory_space<vmem>>, vector<1x128xf32>
    %18 = vector.broadcast %17 : vector<1x128xf32> to vector<16x128xf32>
    %19 = arith.addf %16, %18 : vector<16x128xf32>
    %cst_13 = arith.constant 5.000000e-01 : f32
    %20 = vector.broadcast %cst_13 : f32 to vector<16x128xf32>
    %21 = arith.mulf %20, %19 : vector<16x128xf32>
    %cst_14 = arith.constant 0.707106769 : f32
    %22 = vector.broadcast %cst_14 : f32 to vector<16x128xf32>
    %23 = arith.mulf %19, %22 : vector<16x128xf32>
    %24 = math.erf %23 : vector<16x128xf32>
    %cst_15 = arith.constant 1.000000e+00 : f32
    %25 = vector.broadcast %cst_15 : f32 to vector<16x128xf32>
    %26 = arith.addf %25, %24 : vector<16x128xf32>
    %27 = arith.mulf %21, %26 : vector<16x128xf32>
    %c0_16 = arith.constant 0 : index
    %c0_17 = arith.constant 0 : index
    %28 = vector.load %arg6[%c0_16, %c0_17] : memref<16x128xf32, #tpu.memory_space<vmem>>, vector<16x128xf32>
    tpu.vector_store %arg6[%c0_16, %c0_17], %27 {strides = array<i32>} : memref<16x128xf32, #tpu.memory_space<vmem>>, vector<16x128xf32>,
    return
  }
  func.func @transform_0(%arg0: i32) -> (i32, i32) {
    %c0_i32 = arith.constant 0 : i32
    %c0_i32_0 = arith.constant 0 : i32
    return %arg0, %c0_i32 : i32, i32
  }
  func.func @transform_1(%arg0: i32) -> (i32, i32) {
    %c0_i32 = arith.constant 0 : i32
    %c0_i32_0 = arith.constant 0 : i32
    %c0_i32_1 = arith.constant 0 : i32
    return %c0_i32, %c0_i32_0 : i32, i32
  }
  func.func @transform_2(%arg0: i32) -> (i32, i32) {
    %c0_i32 = arith.constant 0 : i32
    %c0_i32_0 = arith.constant 0 : i32
    %c0_i32_1 = arith.constant 0 : i32
    return %c0_i32, %c0_i32_0 : i32, i32
  }
  func.func @transform_3(%arg0: i32) -> (i32, i32) {
    %c0_i32 = arith.constant 0 : i32
    %c0_i32_0 = arith.constant 0 : i32
    %c0_i32_1 = arith.constant 0 : i32
    return %c0_i32, %c0_i32_0 : i32, i32
  }
  func.func @transform_4(%arg0: i32) -> (i32, i32) {
    %c0_i32 = arith.constant 0 : i32
    %c0_i32_0 = arith.constant 0 : i32
    %c0_i32_1 = arith.constant 0 : i32
    return %c0_i32, %c0_i32_0 : i32, i32
  }
  func.func @transform_5(%arg0: i32) -> (i32, i32) {
    %c0_i32 = arith.constant 0 : i32
    %c0_i32_0 = arith.constant 0 : i32
    return %arg0, %c0_i32 : i32, i32
  }
}

</mosaic_0001>

<bundles_post_ra>
// kernel: forward.1
= control target key start
LH: loop header
LB: loop body
LE: loop exit
PB: predicated region body
PF: predicated region fallthrough
CT: control target
= control target key end

     0   :  { %10 = vsyncpa [#allocation3], 0  ;;  %s519_s0 = inlined_call_operand.vmem [shape: bf16[16,128], index: 0, kind: input, shape index: {}]   ;;  %s520_s1 = inlined_call_operand.hbm [shape: bf16[128,128], index: 1, kind: input, shape index: {}]   ;;  %s521_s2 = inlined_call_operand.vmem [shape: f32[1,128], index: 2, kind: input, shape index: {}]   ;;  %s522_s3 = inlined_call_operand.hbm [shape: bf16[128,128], index: 3, kind: input, shape index: {}]   ;;  %s523_s4 = inlined_call_operand.vmem [shape: f32[1,128], index: 4, kind: input, shape index: {}]   ;;  %s524_s5 = inlined_call_operand.vmem [shape: f32[16,128], index: 5, kind: output, shape index: {}]  }
   0x1   :  { %11 = vsyncpa [#allocation5], 0  ;;  %s462_s18 = smov [#allocation2]  }
   0x2   :  { %s19_s19 = sshll.u32 %s462_s18, 4  ;;  %s20_s19 = int_to_ptr.vmem [resolvable:$true] %s19_s19 }
   0x3   :  { %s426_s20 = scalar_lea.vmem %s20_s19, 1024  ;;  %p431_p1 = scmp.lt.s32.totalorder %s20_s19, %s20_s19 }
   0x4   :  { %p427_p0 = scmp.ne.s32.totalorder %s20_s19, %s426_s20  ;;  %p432_p2 = scmp.lt.s32.totalorder %s426_s20, %s426_s20 }
   0x6   :  { %p433_p3 = por %p432_p2, %p431_p1 }
   0x8   :  { %p434_p4 = pnand %p433_p3, %p427_p0 }
   0xa   :  { %437 = shalt.err (!%p434_p4)
}
   0xb   :  { %s463_s21 = smov 64   ;;  %s464_s22 = smov 4  }
   0xc   :  { %25 = dma.hbm_to_vmem [thread:$0]  %s520_s1, 1024, %s20_s19, [#allocation3], %s463_s21, %s463_s21, %s464_s22  }
   0xd   :  { %s465_s25 = smov [#allocation4]  }
   0xe   :  { %s33_s26 = sshll.u32 %s465_s25, 4  ;;  %s34_s26 = int_to_ptr.vmem [resolvable:$true] %s33_s26 }
   0xf   :  { %s446_s27 = scalar_lea.vmem %s34_s26, 1024  ;;  %p451_p6 = scmp.lt.s32.totalorder %s34_s26, %s34_s26 }
  0x10   :  { %p447_p5 = scmp.ne.s32.totalorder %s34_s26, %s446_s27  ;;  %p452_p7 = scmp.lt.s32.totalorder %s446_s27, %s446_s27 }
  0x12   :  { %p453_p8 = por %p452_p7, %p451_p6 }
  0x14   :  { %p454_p9 = pnand %p453_p8, %p447_p5 }
  0x16   :  { %457 = shalt.err (!%p454_p9)
}
  0x17   :  { %39 = dma.hbm_to_vmem [thread:$0]  %s522_s3, 1024, %s34_s26, [#allocation5], %s463_s21, %s463_s21, %s464_s22  }
  0x18   :  { %458 = dma.done.wait [#allocation3], 1024  }
  0x19   :  { %459 = vsyncadd [#allocation3], 4294966272 }
  0x1a   :  { %460 = dma.done.wait [#allocation5], 1024  }
  0x1b   :  { %461 = vsyncadd [#allocation5], 4294966272  ;;  %v466_v0 = vmov 0.0   ;;  %vm467_vm0 = vmmov 0   ;;  %v393_v1 = vld [vmem:[#allocation2 + $0x38] sm:$0xff]   ;;  %v394_v2 = vld [vmem:[#allocation2 + $0x30] sm:$0xff]  }
  0x1c   :  { %347 = vmatprep.subr.bf16.mxu0 %v466_v0  ;;  %363 = vmatprep.mubr.msk.bf16.mxu0 %vm467_vm0, %v466_v0  ;;  %v395_v3 = vld [vmem:[#allocation2 + $0x28] sm:$0xff]   ;;  %v402_v4 = vld [vmem:[#allocation4 + $0x38] sm:$0xff]   ;;  %v396_v5 = vld [vmem:[#allocation2 + $0x20] sm:$0xff]  }
  0x1d   :  { %367 = vmatprep.subr.bf16.mxu1 %v466_v0  ;;  %383 = vmatprep.mubr.msk.bf16.mxu1 %vm467_vm0, %v466_v0  ;;  %v397_v6 = vld [vmem:[#allocation2 + $0x18] sm:$0xff]   ;;  %v398_v7 = vld [vmem:[#allocation2 + $0x10] sm:$0xff]   ;;  %v399_v8 = vld [vmem:[#allocation2 + $0x8] sm:$0xff]  }
  0x1e   :  { %348 = vmatpush3.bf16.msra.mxu0 %v393_v1  ;;  %368 = vmatpush3.bf16.msra.mxu1 %v402_v4  ;;  %v400_v9 = vld [vmem:[#allocation2] sm:$0xff]   ;;  %v403_v11 = vld [vmem:[#allocation4 + $0x30] sm:$0xff]   ;;  %v404_v12 = vld [vmem:[#allocation4 + $0x28] sm:$0xff]  }
  0x1f   :  { %349 = vmatprep.subr.bf16.mxu0 %v466_v0  ;;  %369 = vmatprep.subr.bf16.mxu1 %v466_v0  ;;  %v401_v10 = vld [vmem:[%s519_s0] sm:$0xff]   ;;  %v406_v14 = vld [vmem:[#allocation4 + $0x18] sm:$0xff]   ;;  %v407_v15 = vld [vmem:[#allocation4 + $0x10] sm:$0xff]  }
  0x20   :  { %v405_v13 = vld [vmem:[#allocation4 + $0x20] sm:$0xff]   ;;  %v408_v16 = vld [vmem:[#allocation4 + $0x8] sm:$0xff]  }
  0x21   :  { %v409_v17 = vld [vmem:[#allocation4] sm:$0xff]  }
  0x22   :  { %350 = vmatpush3.bf16.msra.mxu0 %v394_v2  ;;  %370 = vmatpush3.bf16.msra.mxu1 %v403_v11  ;;  %v310_v18 = vld [vmem:[%s521_s2] ss:$0 sm:$0xff] }
  0x23   :  { %351 = vmatprep.subr.bf16.mxu0 %v466_v0  ;;  %371 = vmatprep.subr.bf16.mxu1 %v466_v0  ;;  %v320_v36 = vld [vmem:[%s523_s4] ss:$0 sm:$0xff] }
  0x26   :  { %352 = vmatpush3.bf16.msra.mxu0 %v395_v3  ;;  %372 = vmatpush3.bf16.msra.mxu1 %v404_v12 }
  0x27   :  { %353 = vmatprep.subr.bf16.mxu0 %v466_v0  ;;  %373 = vmatprep.subr.bf16.mxu1 %v466_v0 }
  0x2a   :  { %354 = vmatpush3.bf16.msra.mxu0 %v396_v5  ;;  %374 = vmatpush3.bf16.msra.mxu1 %v405_v13 }
  0x2b   :  { %355 = vmatprep.subr.bf16.mxu0 %v466_v0  ;;  %375 = vmatprep.subr.bf16.mxu1 %v466_v0 }
  0x2e   :  { %356 = vmatpush3.bf16.msra.mxu0 %v397_v6  ;;  %376 = vmatpush3.bf16.msra.mxu1 %v406_v14 }
  0x2f   :  { %357 = vmatprep.subr.bf16.mxu0 %v466_v0  ;;  %377 = vmatprep.subr.bf16.mxu1 %v466_v0 }
  0x32   :  { %358 = vmatpush3.bf16.msra.mxu0 %v398_v7  ;;  %378 = vmatpush3.bf16.msra.mxu1 %v407_v15 }
  0x33   :  { %359 = vmatprep.subr.bf16.mxu0 %v466_v0  ;;  %379 = vmatprep.subr.bf16.mxu1 %v466_v0 }
  0x36   :  { %360 = vmatpush3.bf16.msra.mxu0 %v399_v8  ;;  %380 = vmatpush3.bf16.msra.mxu1 %v408_v16 }
  0x37   :  { %361 = vmatprep.subr.bf16.mxu0 %v466_v0  ;;  %381 = vmatprep.subr.bf16.mxu1 %v466_v0 }
  0x3a   :  { %362 = vmatpush3.bf16.msra.mxu0 %v400_v9  ;;  %382 = vmatpush3.bf16.msra.mxu1 %v409_v17 }
  0x3d   :  { %364 = vmatmul.mubr.bf16.vlgmr.msra.gmra.mxu0 %v401_v10 }
  0xfd   :  { %v162_v19 = vpop.f32.mrf.mxu0 }
  0xfe   :  { %v163_v20 = vadd.f32 %v310_v18, %v162_v19 }
  0xff   :  { %v365_v21 = vpop.f32.mrf.mxu0 }
 0x100   :  { %v171_v22 = vmul.f32 0.70710677, %v163_v20  ;;  %v169_v30 = vmul.f32 0.5, %v163_v20 }
 0x101   :  { %v165_v23 = vpop.f32.mrf.mxu0 }
 0x102   :  { %410 = verf.f32 %v171_v22  ;;  %v166_v24 = vadd.f32 %v310_v18, %v165_v23 }
 0x103   :  { %v366_v25 = vpop.f32.mrf.mxu0 }
 0x104   :  { %v172_v26 = vmul.f32 0.70710677, %v166_v24  ;;  %v170_v31 = vmul.f32 0.5, %v166_v24 }
 0x106   :  { %412 = verf.f32 %v172_v26 }
 0x10f   :  { %v411_v27 = vpop.eup %410 }
 0x110   :  { %v175_v28 = vadd.f32 1.0, %v411_v27 }
 0x112   :  { %v177_v33 = vmul.f32 %v175_v28, %v169_v30 }
 0x113   :  { %v413_v29 = vpop.eup %412 }
 0x114   :  { %v176_v32 = vadd.f32 1.0, %v413_v29 }
 0x116   :  { %v178_v34 = vmul.f32 %v176_v32, %v170_v31 }
 0x118   :  { %v179_v35 = vpack.c.bf16 %v178_v34, %v177_v33 }
 0x11a   :  { %384 = vmatmul.mubr.bf16.vlgmr.msra.gmra.mxu1 %v179_v35 }
 0x1da   :  { %v285_v37 = vpop.f32.mrf.mxu1 }
 0x1db   :  { %v286_v38 = vadd.f32 %v320_v36, %v285_v37 }
 0x1dc   :  { %v385_v39 = vpop.f32.mrf.mxu1 }
 0x1dd   :  { %v294_v40 = vmul.f32 0.70710677, %v286_v38  ;;  %v292_v46 = vmul.f32 0.5, %v286_v38 }
 0x1de   :  { %v288_v41 = vpop.f32.mrf.mxu1 }
 0x1df   :  { %414 = verf.f32 %v294_v40  ;;  %v289_v42 = vadd.f32 %v320_v36, %v288_v41 }
 0x1e0   :  { %v386_v43 = vpop.f32.mrf.mxu1 }
 0x1e1   :  { %v295_v44 = vmul.f32 0.70710677, %v289_v42  ;;  %v293_v50 = vmul.f32 0.5, %v289_v42 }
 0x1e3   :  { %416 = verf.f32 %v295_v44 }
 0x1ec   :  { %v415_v45 = vpop.eup %414 }
 0x1ed   :  { %v298_v47 = vadd.f32 1.0, %v415_v45 }
 0x1ef   :  { %v300_v48 = vmul.f32 %v298_v47, %v292_v46 }
 0x1f0   :  { %v417_v49 = vpop.eup %416 }
 0x1f1   :  { %302 = vst [vmem:[%s524_s5] sm:$0xff] %v300_v48  ;;  %v299_v51 = vadd.f32 1.0, %v417_v49 }
 0x1f3   :  { %v301_v52 = vmul.f32 %v299_v51, %v293_v50 }
 0x1f5   :  { %303 = vst [vmem:[%s524_s5 + $0x8] sm:$0xff] %v301_v52 }
 0x1f6   :  { %308 = vsyncpa [#allocation3], 1 }
 0x1f7   :  { %309 = vsyncpa [#allocation5], 1 }

</bundles_post_ra>
